<compile_context>
chip_gen: v6e
topology: v6e:2x2x1
jax: 0.10.0
libtpu: 0.0.40
codegen_flags: <defaults>
</compile_context>

<pallas_src>
import functools

import jax
import jax.numpy as jnp
from jax.experimental import pallas as pl
from jax.experimental.pallas import tpu as pltpu

_LANES = 128
_FLAT_WIDTHS = (4096, 2048, 1024, 512, 256, 128)   # lane-dense slab widths
_SMALL_ELEMS = 256 * 1024   # below this, XLA's (fusable) convert beats a pallas_call launch


def _cast_kernel(x_ref, o_ref):
    # Elementwise cast on the VPU; the kernel is DMA/HBM-bandwidth bound.
    o_ref[...] = x_ref[...].astype(jnp.float32)


def _round_up(x: int, m: int) -> int:
    return ((x + m - 1) // m) * m


def _sublane_multiple(dtype) -> int:
    # Sub-32-bit dtypes pack along sublanes: 8 rows (32-bit), 16 (16-bit), 32 (8-bit).
    itemsize = int(jnp.dtype(dtype).itemsize)
    return max(8, 32 // max(itemsize, 1))


@functools.lru_cache(maxsize=None)
def _vmem_capacity_bytes() -> int:
    try:
        return int(pltpu.get_tpu_info().vmem_capacity_bytes)
    except Exception:
        return 64 << 20   # conservative (v7x-sized) fallback


def _pick_tile_rows(rows: int, cols: int, in_dtype) -> int:
    """Moderate row-tile: ~2-4 MiB of in+out traffic per grid step, grid kept long."""
    sub = _sublane_multiple(in_dtype)
    row_traffic = cols * (int(jnp.dtype(in_dtype).itemsize) + 4)   # in + f32 out per row
    vmem_cap = _vmem_capacity_bytes()
    is_v7x = vmem_cap <= (96 << 20)   # 64 MiB/TC => v7x; 128 MiB => v5e/v6e
    # Per-step overhead (~0.35us) is amortized well below 1 MiB on v5e/v6e and
    # around ~1 MiB on v7x's 3.2 TB/s HBM; 2 / 4 MiB keeps grids long (>=8 steps
    # for big arrays) while staying far above the amortization floor.
    target_traffic = (4 << 20) if is_v7x else (2 << 20)

    tile_n = max(sub, (target_traffic // row_traffic) // sub * sub)
    tile_n = min(tile_n, _round_up(rows, sub))          # never larger than the array

    # On v7x make sure there are >= 2 grid steps so dimension_semantics=("parallel",)
    # can actually shard rows (and DMA streams) across both TensorCores.
    if is_v7x and rows >= 2 * sub:
        tile_n = min(tile_n, max(sub, (rows // 2) // sub * sub))
    return tile_n


def _fits_2d_path(rows: int, cols: int, dtype) -> bool:
    if cols % _LANES != 0:
        return False
    sub = _sublane_multiple(dtype)
    row_traffic = cols * (int(jnp.dtype(dtype).itemsize) + 4)
    # Even the minimum (one-sublane-group) tile, double-buffered, must fit comfortably.
    return 2 * sub * row_traffic <= _vmem_capacity_bytes() // 4


def _cast_rows_2d(x: jax.Array) -> jax.Array:
    """Cast a 2D array (cols % 128 == 0) to float32 with a row-tiled kernel."""
    rows, cols = x.shape
    in_itemsize = int(jnp.dtype(x.dtype).itemsize)
    tile_n = _pick_tile_rows(rows, cols, x.dtype)
    tile_bytes = tile_n * cols * (in_itemsize + 4)       # in + out bytes per step
    vmem_cap = _vmem_capacity_bytes()
    # Double-buffered in+out needs 2*tile_bytes; request ~2x that plus headroom,
    # never more than half of physical VMEM.
    vmem_limit = int(min(vmem_cap // 2, 4 * tile_bytes + (2 << 20)))

    n_elems = rows * cols
    # Ragged final block: Pallas pads reads (garbage) and masks the out-of-bounds
    # writes — no wrapper-side jnp.pad / output slice (no extra HBM passes).
    grid = (pl.cdiv(rows, tile_n),)

    return pl.pallas_call(
        _cast_kernel,
        out_shape=jax.ShapeDtypeStruct((rows, cols), jnp.float32),
        grid=grid,
        in_specs=[pl.BlockSpec((tile_n, cols), lambda i: (i, 0))],
        out_specs=pl.BlockSpec((tile_n, cols), lambda i: (i, 0)),
        compiler_params=pltpu.CompilerParams(
            dimension_semantics=("parallel",),   # megacore / 2-TC sharding on v7x
            vmem_limit_bytes=vmem_limit,
        ),
        cost_estimate=pl.CostEstimate(
            flops=0,
            transcendentals=0,
            bytes_accessed=n_elems * in_itemsize + n_elems * 4,
        ),
    )(x)


def _cast_flat(x: jax.Array) -> jax.Array:
    """Reshape (free) to a lane-dense slab whose width divides size; cast; restore."""
    orig_shape = x.shape
    flat = x.reshape(-1)
    total = flat.shape[0]
    for width in _FLAT_WIDTHS:
        if total % width == 0:
            out = _cast_rows_2d(flat.reshape(total // width, width))
            return out.reshape(orig_shape)
    # Truly ragged size: padding/slicing would re-read and re-write the whole
    # array (~3x HBM traffic); XLA's convert already runs at the HBM roofline.
    return x.astype(jnp.float32)


def to_float32_pallas(feature, *, prefer_xla_fusion: bool = False) -> jax.Array:
    """`feature.float()` equivalent: cast any array-like to float32."""
    feature = jnp.asarray(feature)
    if feature.dtype == jnp.float32:
        return feature                              # .float() on float32 is a no-op
    # Inside a larger jit a bare astype can fuse into its consumer and skip the
    # 4N-byte f32 materialization entirely; a pallas_call blocks that fusion.
    if prefer_xla_fusion or feature.ndim == 0 or feature.size < _SMALL_ELEMS:
        return feature.astype(jnp.float32)
    if feature.ndim == 2 and _fits_2d_path(feature.shape[0], feature.shape[1], feature.dtype):
        return _cast_rows_2d(feature)               # already lane-dense, no reshape
    return _cast_flat(feature)                      # 1D / nD / odd-cols path


class ToTensor:
    """JAX/Pallas port of the PyTorch ToTensor transform."""

    def __call__(self, sample):
        sid, content, label, _, feature = sample
        return (sid, content, label, to_float32_pallas(feature))


if __name__ == "__main__":
    key = jax.random.PRNGKey(0)
    k1, k2, k3 = jax.random.split(key, 3)
    transform = ToTensor()

    # 1) Lane-dense 2D int32 feature with rows that do NOT divide the tile (and are
    #    not even a multiple of 8) -> direct 2D kernel path, exercises the masked
    #    ragged final block (the correctness concern flagged in review).
    feat2d = jax.random.randint(k1, (1012, 384), minval=-100, maxval=100, dtype=jnp.int32)
    sid, content, label, out2d = transform(("sample_id_0", "some content", 3, None, feat2d))
    jax.block_until_ready(out2d)
    assert out2d.dtype == jnp.float32 and out2d.shape == feat2d.shape
    assert jnp.array_equal(out2d, feat2d.astype(jnp.float32))
    assert sid == "sample_id_0" and content == "some content" and label == 3

    # 2) 4D int16 feature -> flattened lane-dense slab path (width divides size, no pad).
    feat4d = jax.random.randint(k2, (8, 3, 128, 128), minval=-30000, maxval=30000,
                                dtype=jnp.int32).astype(jnp.int16)
    _, _, _, out4d = transform(("s1", "c", 0, None, feat4d))
    jax.block_until_ready(out4d)
    assert out4d.dtype == jnp.float32 and out4d.shape == feat4d.shape
    assert jnp.array_equal(out4d, feat4d.astype(jnp.float32))

    # 3) Small feature (module-spec-sized) -> XLA short-circuit, still correct.
    small = jax.random.randint(k3, (2, 4, 16, 16), minval=0, maxval=255,
                               dtype=jnp.int32).astype(jnp.uint8)
    _, _, _, out_small = transform(("s2", "c", 1, None, small))
    jax.block_until_ready(out_small)
    assert out_small.dtype == jnp.float32
    assert jnp.array_equal(out_small, small.astype(jnp.float32))

    # 4) Truly ragged 1D size (not a multiple of 128) -> XLA convert fallback
    #    (deliberate: pad+slice would triple HBM traffic for zero gain).
    ragged = jnp.arange(70001, dtype=jnp.int32).astype(jnp.uint8)
    _, _, _, out_r = transform(("s3", "c", 2, None, ragged))
    jax.block_until_ready(out_r)
    assert out_r.dtype == jnp.float32
    assert jnp.array_equal(out_r, ragged.astype(jnp.float32))

    # 5) float32 passthrough (.float() is a no-op).
    f32 = jnp.ones((4, 4), jnp.float32)
    _, _, _, out_f = transform(("s4", "c", 4, None, f32))
    assert out_f.dtype == jnp.float32

    print("KERNEL_OK")
</pallas_src>

<mosaic_0001>
module attributes {stable_mosaic.version = 11 : i64} {
  func.func @_cast_kernel(%arg0: i32, %arg1: memref<504x384xi32, #tpu.memory_space<vmem>>, %arg2: memref<504x384xf32, #tpu.memory_space<vmem>>) attributes {dimension_semantics = [#tpu.dimension_semantics<parallel>], iteration_bounds = array<i64: 3>, scalar_prefetch = 0 : i64, scratch_operands = 0 : i64, tpu.core_type = #tpu.core_type<tc>, window_params = [{transform_indices = @transform_0, window_bounds = array<i64: 504, 384>}, {transform_indices = @transform_1, window_bounds = array<i64: 504, 384>}]} {
    %c0 = arith.constant 0 : index
    %c0_0 = arith.constant 0 : index
    %0 = vector.load %arg1[%c0, %c0_0] : memref<504x384xi32, #tpu.memory_space<vmem>>, vector<504x384xi32>
    %1 = arith.sitofp %0 : vector<504x384xi32> to vector<504x384xf32>
    %c0_1 = arith.constant 0 : index
    %c0_2 = arith.constant 0 : index
    %2 = vector.load %arg2[%c0_1, %c0_2] : memref<504x384xf32, #tpu.memory_space<vmem>>, vector<504x384xf32>
    tpu.vector_store %arg2[%c0_1, %c0_2], %1 {strides = array<i32>} : memref<504x384xf32, #tpu.memory_space<vmem>>, vector<504x384xf32>,
    return
  }
  func.func @transform_0(%arg0: i32) -> (i32, i32) {
    %c0_i32 = arith.constant 0 : i32
    %c0_i32_0 = arith.constant 0 : i32
    return %arg0, %c0_i32 : i32, i32
  }
  func.func @transform_1(%arg0: i32) -> (i32, i32) {
    %c0_i32 = arith.constant 0 : i32
    %c0_i32_0 = arith.constant 0 : i32
    return %arg0, %c0_i32 : i32, i32
  }
}

</mosaic_0001>

<bundles_post_ra>
// kernel: tpu_custom_call.1
= control target key start
LH: loop header
LB: loop body
LE: loop exit
PB: predicated region body
PF: predicated region fallthrough
CT: control target
= control target key end

     0   :  { %6 = vsyncpa [#allocation3], 0  ;;  %s1538_s0 = inlined_call_operand.hbm [shape: s32[1012,384], index: 0, kind: input, shape index: {}]   ;;  %s1539_s1 = inlined_call_operand.hbm [shape: f32[1012,384], index: 1, kind: output, shape index: {}]  }
   0x1   :  { %8 = vsyncpa [#allocation3 + $0x1], 0 }
   0x2   :  { %9 = vsyncpa [#allocation4], 0 }
   0x3   :  { %11 = vsyncpa [#allocation4 + $0x1], 0  ;;  %s990_s6 = smov 0   ;;  %s992_s7 = smov 0  }
   0x4   :  { %s994_s8 = smov 0   ;;  %s996_s9 = smov 0  }
   0x5 LB: > { %s1011_s10 = sadd.s32 4294967295, %s972_s9   ;;  %s817_s11 = sadd.s32 4294967294, %s972_s9   ;;  %s972_s9 = sphi %s996_s9, %s1547_s9   ;;  %s968_s8 = sphi %s994_s8, %s1546_s8   ;;  %s964_s7 = sphi %s992_s7, %s1545_s7   ;;  %s960_s6 = sphi %s990_s6, %s1544_s6  }
   0x6   : > { %s1015_s12 = sadd.s32 1, %s972_s9   ;;  %s24_s13 = sadd.s32 1, %s968_s8 }
   0x7   : > { %s21_s14 = ssub.s32 %s972_s9, %s1015_s12  ;;  %p31_p0 = scmp.ne.s32.totalorder %s968_s8, %s964_s7 }
   0x8   : > { %p22_p1 = scmp.eq.s32.totalorder %s21_s14, 0  ;;  %p32_p2 = scmp.eq.s32.totalorder %s972_s9, 0 }
   0x9   : > { %p37_p3 = scmp.ne.s32.totalorder %s964_s7, %s960_s6  ;;  %p38_p4 = scmp.eq.s32.totalorder %s1011_s10, 0 }
   0xa   : > { %s1027_s15 = scalar_select %p22_p1, %s968_s8, %s24_s13  }
   0xb   : > { %p33_p5 = por %p32_p2, %p31_p0  ;;  %p1029_p6 = por %p38_p4, %p37_p3 }
   0xc   : > { %p61_p7 = scmp.eq.s32.totalorder %s1011_s10, 2  ;;  %p67_p8 = scmp.eq.s32.totalorder %s817_s11, 2 }
   0xd   : > { %p819_p11 = scmp.ge.s32.totalorder %s972_s9, 3 }
   0xe   : > { %p1034_p9 = por %p61_p7, %p31_p0  ;;  %p1038_p10 = por %p67_p8, %p37_p3 }
   0xf   : > { %83 = sbr.rel (%p819_p11) target bundleno = 55 (0x37), region = 16 }
  0x10   : > { %s1542_s18 = scalar_select %p1038_p10, 1, 0 }
  0x14   : > { %86 = sbr.rel (!%p33_p5) target bundleno = 55 (0x37), region = 20  ;;  %s87_s19 = sand.u32 (%p33_p5), 1, %s968_s8  }
  0x15   : > { %s92_s20 = smul.u32 (%p33_p5), 63, %s972_s9  ;;  %s1048_s25 = scalar_lea.sflag (%p33_p5), [#allocation3], %s87_s19 }
  0x16   : > { %s833_s21 = smul.u32 (%p33_p5), 1512, %s87_s19 }
  0x17   : > { %s93_s22 = ssub.s32 (%p33_p5), 127, %s92_s20 }
  0x18   : > { %p94_p12 = scmp.lt.s32.totalorder (%p33_p5), %s93_s22, 63  ;;  %s91_s26 = scalar_lea.vmem (%p33_p5), [#allocation2], %s833_s21 }
  0x1a   : > { %s1549_s22 = smov (!%p94_p12, %s93_s22), 63 }
  0x1b   : > { %s1045_s23 = smul.u32 384, %s1549_s22 }
  0x1d   : > { %s99_s24 = ssub.s32 24192, %s1045_s23 }
  0x1e   : > { %100 = vsyncadd %s1048_s25, %s99_s24  ;;  %p822_p13 = scmp.ne.s32.totalorder %s1045_s23, 0  ;;  %s843_s27 = smul.u32 24192, %s972_s9 }
  0x1f   : > { %s106_s28 = sshll.u32 %s91_s26, 4  ;;  %s886_s11 = scalar_lea.hbm %s1538_s0, 48768  ;;  %s1058_s28 = int_to_ptr.vmem [resolvable:$true] %s106_s28 }
  0x20   : > { %s1056_s2 = scalar_lea.hbm %s1538_s0, %s843_s27 }
  0x21   : > { %s882_s3 = scalar_lea.hbm %s1056_s2, %s1045_s23  ;;  %p887_p3 = scmp.lt.s32.totalorder %s1056_s2, %s1538_s0 }
  0x22   : > { %p883_p0 = scmp.ne.s32.totalorder %s1056_s2, %s882_s3  ;;  %p888_p4 = scmp.lt.s32.totalorder %s886_s11, %s882_s3 }
  0x24   : > { %p884_p1 = pnand %p883_p0, %p822_p13  ;;  %p889_p5 = por %p888_p4, %p887_p3 }
  0x26   : > { %p885_p2 = pneg %p884_p1 }
  0x28   : > { %p890_p7 = pnand %p889_p5, %p885_p2 }
  0x2a   : > { %893 = shalt.err (!%p890_p7)
}
  0x2b   : > { %s894_s19 = scalar_lea.vmem %s1058_s28, %s1045_s23  ;;  %s974_s20 = smov [#allocation2]  }
  0x2c   : > { %p895_p8 = scmp.ne.s32.totalorder %s1058_s28, %s894_s19  ;;  %s898_s21 = sshll.u32 %s974_s20, 4  ;;  %s899_s21 = int_to_ptr.vmem [resolvable:$false] %s898_s21 }
  0x2d   : > { %s900_s22 = scalar_lea.vmem %s899_s21, 48384  ;;  %p901_p0 = scmp.lt.s32.totalorder %s1058_s28, %s899_s21 }
  0x2e   : > { %p896_p11 = pnand %p895_p8, %p822_p13  ;;  %p902_p1 = scmp.lt.s32.totalorder %s900_s22, %s894_s19 }
  0x30   : > { %p897_p12 = pneg %p896_p11  ;;  %p903_p10 = por %p902_p1, %p901_p0 }
  0x32   : > { %p904_p3 = pnand %p903_p10, %p897_p12 }
  0x34   : > { %907 = shalt.err (!%p904_p3)
}
  0x35   : > { %s975_s24 = smov 384   ;;  %s976_s26 = smov 24  }
  0x36   : > { %112 = dma.hbm_to_vmem [thread:$0]  (%p822_p13), %s1056_s2, %s1045_s23, %s1058_s28, %s1048_s25, %s975_s24, %s975_s24, %s976_s26  }
  0x37 PF: > { %p825_p2 = scmp.ge.s32.totalorder %s972_s9, 1  ;;  %p114_p4 = scmp.lt.s32.totalorder %s972_s9, 4 }
  0x39   : > { %p115_p5 = pnand %p825_p2, %p114_p4 }
  0x3a   : > { %s1087_s27 = sand.u32 (!%p115_p5), 1, %s964_s7  }
  0x3b   : > { %118 = sbr.rel (%p115_p5) target bundleno = 191 (0xbf), region = 24  ;;  %s121_s30 = scalar_lea.sflag (!%p115_p5), [#allocation3], %s1087_s27 }
  0x3c   : > { %s835_s29 = smul.u32 (!%p115_p5), 1512, %s1087_s27 }
  0x3e   : > { %s1091_s3 = scalar_lea.vmem (!%p115_p5), [#allocation2], %s835_s29 }
  0x40   : > { %951 = dma.done.wait (%p1029_p6), %s121_s30, 24192  }
  0x41   : > { %953 = vsyncadd (%p1029_p6), %s121_s30, 4294943104  ;;  %v155_v0 = vld [vmem:[%s1091_s3] sm:$0xff]  ;;  %v156_v1 = vld [vmem:[%s1091_s3 + $0x8] sm:$0xff]  ;;  %s1106_s16 = scalar_lea.vmem [#allocation5], %s835_s29  ;;  %s723_s23 = scalar_lea.sflag [#allocation4], %s1087_s27 }
  0x42   : > { %v157_v2 = vld [vmem:[%s1091_s3 + $0x10] sm:$0xff]  ;;  %v344_v3 = vcvt.s32.f32 %v155_v0  ;;  %v345_v4 = vcvt.s32.f32 %v156_v1  ;;  %v158_v6 = vld [vmem:[%s1091_s3 + $0x18] sm:$0xff]  ;;  %v159_v7 = vld [vmem:[%s1091_s3 + $0x20] sm:$0xff]  ;;  %s730_s25 = smul.u32 (%p1034_p9), 63, %s1011_s10 }
  0x43   : > { %v346_v5 = vcvt.s32.f32 %v157_v2  ;;  %v160_v8 = vld [vmem:[%s1091_s3 + $0x28] sm:$0xff]  ;;  %v347_v9 = vcvt.s32.f32 %v158_v6  ;;  %v348_v10 = vcvt.s32.f32 %v159_v7  ;;  %v161_v12 = vld [vmem:[%s1091_s3 + $0x30] sm:$0xff]  ;;  %v162_v13 = vld [vmem:[%s1091_s3 + $0x38] sm:$0xff] }
  0x44   : > { %v349_v11 = vcvt.s32.f32 %v160_v8  ;;  %v163_v14 = vld [vmem:[%s1091_s3 + $0x40] sm:$0xff]  ;;  %533 = vst [vmem:[%s1106_s16] sm:$0xff] %v344_v3  ;;  %534 = vst [vmem:[%s1106_s16 + $0x8] sm:$0xff] %v345_v4  ;;  %v350_v15 = vcvt.s32.f32 %v161_v12  ;;  %v351_v16 = vcvt.s32.f32 %v162_v13  ;;  %v164_v18 = vld [vmem:[%s1091_s3 + $0x48] sm:$0xff]  ;;  %s731_s28 = ssub.s32 (%p1034_p9), 127, %s730_s25 }
  0x45   : > { %535 = vst [vmem:[%s1106_s16 + $0x10] sm:$0xff] %v346_v5  ;;  %v352_v17 = vcvt.s32.f32 %v163_v14  ;;  %v165_v19 = vld [vmem:[%s1091_s3 + $0x50] sm:$0xff]  ;;  %v166_v20 = vld [vmem:[%s1091_s3 + $0x58] sm:$0xff]  ;;  %536 = vst [vmem:[%s1106_s16 + $0x18] sm:$0xff] %v347_v9  ;;  %v353_v21 = vcvt.s32.f32 %v164_v18  ;;  %p732_p6 = scmp.lt.s32.totalorder (%p1034_p9), %s731_s28, 63 }
  0x46   : > { %537 = vst [vmem:[%s1106_s16 + $0x20] sm:$0xff] %v348_v10  ;;  %538 = vst [vmem:[%s1106_s16 + $0x28] sm:$0xff] %v349_v11  ;;  %v354_v22 = vcvt.s32.f32 %v165_v19  ;;  %v355_v23 = vcvt.s32.f32 %v166_v20  ;;  %v167_v24 = vld [vmem:[%s1091_s3 + $0x60] sm:$0xff]  ;;  %v168_v25 = vld [vmem:[%s1091_s3 + $0x68] sm:$0xff] }
  0x47   : > { %v169_v26 = vld [vmem:[%s1091_s3 + $0x70] sm:$0xff]  ;;  %539 = vst [vmem:[%s1106_s16 + $0x30] sm:$0xff] %v350_v15  ;;  %540 = vst [vmem:[%s1106_s16 + $0x38] sm:$0xff] %v351_v16  ;;  %v356_v27 = vcvt.s32.f32 %v167_v24  ;;  %v357_v28 = vcvt.s32.f32 %v168_v25  ;;  %v170_v30 = vld [vmem:[%s1091_s3 + $0x78] sm:$0xff] }
  0x48   : > { %541 = vst [vmem:[%s1106_s16 + $0x40] sm:$0xff] %v352_v17  ;;  %v358_v29 = vcvt.s32.f32 %v169_v26  ;;  %v171_v31 = vld [vmem:[%s1091_s3 + $0x80] sm:$0xff]  ;;  %v172_v32 = vld [vmem:[%s1091_s3 + $0x88] sm:$0xff]  ;;  %542 = vst [vmem:[%s1106_s16 + $0x48] sm:$0xff] %v353_v21  ;;  %v359_v33 = vcvt.s32.f32 %v170_v30 }
  0x49   : > { %543 = vst [vmem:[%s1106_s16 + $0x50] sm:$0xff] %v354_v22  ;;  %544 = vst [vmem:[%s1106_s16 + $0x58] sm:$0xff] %v355_v23  ;;  %v360_v34 = vcvt.s32.f32 %v171_v31  ;;  %v361_v35 = vcvt.s32.f32 %v172_v32  ;;  %v173_v36 = vld [vmem:[%s1091_s3 + $0x90] sm:$0xff]  ;;  %v174_v37 = vld [vmem:[%s1091_s3 + $0x98] sm:$0xff] }
  0x4a   : > { %v175_v38 = vld [vmem:[%s1091_s3 + $0xa0] sm:$0xff]  ;;  %545 = vst [vmem:[%s1106_s16 + $0x60] sm:$0xff] %v356_v27  ;;  %546 = vst [vmem:[%s1106_s16 + $0x68] sm:$0xff] %v357_v28  ;;  %v362_v39 = vcvt.s32.f32 %v173_v36  ;;  %v363_v40 = vcvt.s32.f32 %v174_v37  ;;  %v176_v42 = vld [vmem:[%s1091_s3 + $0xa8] sm:$0xff] }
  0x4b   : > { %547 = vst [vmem:[%s1106_s16 + $0x70] sm:$0xff] %v358_v29  ;;  %v364_v41 = vcvt.s32.f32 %v175_v38  ;;  %v177_v43 = vld [vmem:[%s1091_s3 + $0xb0] sm:$0xff]  ;;  %v178_v44 = vld [vmem:[%s1091_s3 + $0xb8] sm:$0xff]  ;;  %548 = vst [vmem:[%s1106_s16 + $0x78] sm:$0xff] %v359_v33  ;;  %v365_v45 = vcvt.s32.f32 %v176_v42 }
  0x4c   : > { %549 = vst [vmem:[%s1106_s16 + $0x80] sm:$0xff] %v360_v34  ;;  %550 = vst [vmem:[%s1106_s16 + $0x88] sm:$0xff] %v361_v35  ;;  %v366_v46 = vcvt.s32.f32 %v177_v43  ;;  %v367_v47 = vcvt.s32.f32 %v178_v44  ;;  %v179_v48 = vld [vmem:[%s1091_s3 + $0xc0] sm:$0xff]  ;;  %v180_v49 = vld [vmem:[%s1091_s3 + $0xc8] sm:$0xff] }
  0x4d   : > { %v181_v50 = vld [vmem:[%s1091_s3 + $0xd0] sm:$0xff]  ;;  %551 = vst [vmem:[%s1106_s16 + $0x90] sm:$0xff] %v362_v39  ;;  %552 = vst [vmem:[%s1106_s16 + $0x98] sm:$0xff] %v363_v40  ;;  %v368_v51 = vcvt.s32.f32 %v179_v48  ;;  %v369_v52 = vcvt.s32.f32 %v180_v49  ;;  %v182_v54 = vld [vmem:[%s1091_s3 + $0xd8] sm:$0xff] }
  0x4e   : > { %553 = vst [vmem:[%s1106_s16 + $0xa0] sm:$0xff] %v364_v41  ;;  %v370_v53 = vcvt.s32.f32 %v181_v50  ;;  %v183_v55 = vld [vmem:[%s1091_s3 + $0xe0] sm:$0xff]  ;;  %v184_v56 = vld [vmem:[%s1091_s3 + $0xe8] sm:$0xff]  ;;  %554 = vst [vmem:[%s1106_s16 + $0xa8] sm:$0xff] %v365_v45  ;;  %v371_v57 = vcvt.s32.f32 %v182_v54 }
  0x4f   : > { %555 = vst [vmem:[%s1106_s16 + $0xb0] sm:$0xff] %v366_v46  ;;  %556 = vst [vmem:[%s1106_s16 + $0xb8] sm:$0xff] %v367_v47  ;;  %v372_v58 = vcvt.s32.f32 %v183_v55  ;;  %v373_v59 = vcvt.s32.f32 %v184_v56  ;;  %v185_v60 = vld [vmem:[%s1091_s3 + $0xf0] sm:$0xff]  ;;  %v186_v61 = vld [vmem:[%s1091_s3 + $0xf8] sm:$0xff] }
  0x50   : > { %v187_v62 = vld [vmem:[%s1091_s3 + $0x100] sm:$0xff]  ;;  %557 = vst [vmem:[%s1106_s16 + $0xc0] sm:$0xff] %v368_v51  ;;  %558 = vst [vmem:[%s1106_s16 + $0xc8] sm:$0xff] %v369_v52  ;;  %v374_v63 = vcvt.s32.f32 %v185_v60  ;;  %v375_v0 = vcvt.s32.f32 %v186_v61  ;;  %v188_v2 = vld [vmem:[%s1091_s3 + $0x108] sm:$0xff] }
  0x51   : > { %559 = vst [vmem:[%s1106_s16 + $0xd0] sm:$0xff] %v370_v53  ;;  %v376_v1 = vcvt.s32.f32 %v187_v62  ;;  %v189_v3 = vld [vmem:[%s1091_s3 + $0x110] sm:$0xff]  ;;  %v190_v4 = vld [vmem:[%s1091_s3 + $0x118] sm:$0xff]  ;;  %560 = vst [vmem:[%s1106_s16 + $0xd8] sm:$0xff] %v371_v57  ;;  %v377_v5 = vcvt.s32.f32 %v188_v2 }
  0x52   : > { %561 = vst [vmem:[%s1106_s16 + $0xe0] sm:$0xff] %v372_v58  ;;  %562 = vst [vmem:[%s1106_s16 + $0xe8] sm:$0xff] %v373_v59  ;;  %v378_v6 = vcvt.s32.f32 %v189_v3  ;;  %v379_v7 = vcvt.s32.f32 %v190_v4  ;;  %v191_v8 = vld [vmem:[%s1091_s3 + $0x120] sm:$0xff]  ;;  %v192_v9 = vld [vmem:[%s1091_s3 + $0x128] sm:$0xff] }
  0x53   : > { %v193_v10 = vld [vmem:[%s1091_s3 + $0x130] sm:$0xff]  ;;  %563 = vst [vmem:[%s1106_s16 + $0xf0] sm:$0xff] %v374_v63  ;;  %564 = vst [vmem:[%s1106_s16 + $0xf8] sm:$0xff] %v375_v0  ;;  %v380_v11 = vcvt.s32.f32 %v191_v8  ;;  %v381_v12 = vcvt.s32.f32 %v192_v9  ;;  %v194_v14 = vld [vmem:[%s1091_s3 + $0x138] sm:$0xff] }
  0x54   : > { %565 = vst [vmem:[%s1106_s16 + $0x100] sm:$0xff] %v376_v1  ;;  %v382_v13 = vcvt.s32.f32 %v193_v10  ;;  %v195_v15 = vld [vmem:[%s1091_s3 + $0x140] sm:$0xff]  ;;  %v196_v16 = vld [vmem:[%s1091_s3 + $0x148] sm:$0xff]  ;;  %566 = vst [vmem:[%s1106_s16 + $0x108] sm:$0xff] %v377_v5  ;;  %v383_v17 = vcvt.s32.f32 %v194_v14 }
  0x55   : > { %567 = vst [vmem:[%s1106_s16 + $0x110] sm:$0xff] %v378_v6  ;;  %568 = vst [vmem:[%s1106_s16 + $0x118] sm:$0xff] %v379_v7  ;;  %v384_v18 = vcvt.s32.f32 %v195_v15  ;;  %v385_v19 = vcvt.s32.f32 %v196_v16  ;;  %v197_v20 = vld [vmem:[%s1091_s3 + $0x150] sm:$0xff]  ;;  %v198_v21 = vld [vmem:[%s1091_s3 + $0x158] sm:$0xff] }
  0x56   : > { %v199_v22 = vld [vmem:[%s1091_s3 + $0x160] sm:$0xff]  ;;  %569 = vst [vmem:[%s1106_s16 + $0x120] sm:$0xff] %v380_v11  ;;  %570 = vst [vmem:[%s1106_s16 + $0x128] sm:$0xff] %v381_v12  ;;  %v386_v23 = vcvt.s32.f32 %v197_v20  ;;  %v387_v24 = vcvt.s32.f32 %v198_v21  ;;  %v200_v26 = vld [vmem:[%s1091_s3 + $0x168] sm:$0xff] }
  0x57   : > { %571 = vst [vmem:[%s1106_s16 + $0x130] sm:$0xff] %v382_v13  ;;  %v388_v25 = vcvt.s32.f32 %v199_v22  ;;  %v201_v27 = vld [vmem:[%s1091_s3 + $0x170] sm:$0xff]  ;;  %v202_v28 = vld [vmem:[%s1091_s3 + $0x178] sm:$0xff]  ;;  %572 = vst [vmem:[%s1106_s16 + $0x138] sm:$0xff] %v383_v17  ;;  %v389_v29 = vcvt.s32.f32 %v200_v26 }
  0x58   : > { %573 = vst [vmem:[%s1106_s16 + $0x140] sm:$0xff] %v384_v18  ;;  %574 = vst [vmem:[%s1106_s16 + $0x148] sm:$0xff] %v385_v19  ;;  %v390_v30 = vcvt.s32.f32 %v201_v27  ;;  %v391_v31 = vcvt.s32.f32 %v202_v28  ;;  %v203_v32 = vld [vmem:[%s1091_s3 + $0x180] sm:$0xff]  ;;  %v204_v33 = vld [vmem:[%s1091_s3 + $0x188] sm:$0xff] }
  0x59   : > { %v205_v34 = vld [vmem:[%s1091_s3 + $0x190] sm:$0xff]  ;;  %575 = vst [vmem:[%s1106_s16 + $0x150] sm:$0xff] %v386_v23  ;;  %576 = vst [vmem:[%s1106_s16 + $0x158] sm:$0xff] %v387_v24  ;;  %v392_v35 = vcvt.s32.f32 %v203_v32  ;;  %v393_v36 = vcvt.s32.f32 %v204_v33  ;;  %v206_v38 = vld [vmem:[%s1091_s3 + $0x198] sm:$0xff] }
  0x5a   : > { %577 = vst [vmem:[%s1106_s16 + $0x160] sm:$0xff] %v388_v25  ;;  %v394_v37 = vcvt.s32.f32 %v205_v34  ;;  %v207_v39 = vld [vmem:[%s1091_s3 + $0x1a0] sm:$0xff]  ;;  %v208_v40 = vld [vmem:[%s1091_s3 + $0x1a8] sm:$0xff]  ;;  %578 = vst [vmem:[%s1106_s16 + $0x168] sm:$0xff] %v389_v29  ;;  %v395_v41 = vcvt.s32.f32 %v206_v38 }
  0x5b   : > { %579 = vst [vmem:[%s1106_s16 + $0x170] sm:$0xff] %v390_v30  ;;  %580 = vst [vmem:[%s1106_s16 + $0x178] sm:$0xff] %v391_v31  ;;  %v396_v42 = vcvt.s32.f32 %v207_v39  ;;  %v397_v43 = vcvt.s32.f32 %v208_v40  ;;  %v209_v44 = vld [vmem:[%s1091_s3 + $0x1b0] sm:$0xff]  ;;  %v210_v45 = vld [vmem:[%s1091_s3 + $0x1b8] sm:$0xff] }
  0x5c   : > { %v211_v46 = vld [vmem:[%s1091_s3 + $0x1c0] sm:$0xff]  ;;  %581 = vst [vmem:[%s1106_s16 + $0x180] sm:$0xff] %v392_v35  ;;  %582 = vst [vmem:[%s1106_s16 + $0x188] sm:$0xff] %v393_v36  ;;  %v398_v47 = vcvt.s32.f32 %v209_v44  ;;  %v399_v48 = vcvt.s32.f32 %v210_v45  ;;  %v212_v50 = vld [vmem:[%s1091_s3 + $0x1c8] sm:$0xff] }
  0x5d   : > { %583 = vst [vmem:[%s1106_s16 + $0x190] sm:$0xff] %v394_v37  ;;  %v400_v49 = vcvt.s32.f32 %v211_v46  ;;  %v213_v51 = vld [vmem:[%s1091_s3 + $0x1d0] sm:$0xff]  ;;  %v214_v52 = vld [vmem:[%s1091_s3 + $0x1d8] sm:$0xff]  ;;  %584 = vst [vmem:[%s1106_s16 + $0x198] sm:$0xff] %v395_v41  ;;  %v401_v53 = vcvt.s32.f32 %v212_v50 }
  0x5e   : > { %585 = vst [vmem:[%s1106_s16 + $0x1a0] sm:$0xff] %v396_v42  ;;  %586 = vst [vmem:[%s1106_s16 + $0x1a8] sm:$0xff] %v397_v43  ;;  %v402_v54 = vcvt.s32.f32 %v213_v51  ;;  %v403_v55 = vcvt.s32.f32 %v214_v52  ;;  %v215_v56 = vld [vmem:[%s1091_s3 + $0x1e0] sm:$0xff]  ;;  %v216_v57 = vld [vmem:[%s1091_s3 + $0x1e8] sm:$0xff] }
  0x5f   : > { %v217_v58 = vld [vmem:[%s1091_s3 + $0x1f0] sm:$0xff]  ;;  %587 = vst [vmem:[%s1106_s16 + $0x1b0] sm:$0xff] %v398_v47  ;;  %588 = vst [vmem:[%s1106_s16 + $0x1b8] sm:$0xff] %v399_v48  ;;  %v404_v59 = vcvt.s32.f32 %v215_v56  ;;  %v405_v60 = vcvt.s32.f32 %v216_v57  ;;  %v218_v62 = vld [vmem:[%s1091_s3 + $0x1f8] sm:$0xff] }
  0x60   : > { %589 = vst [vmem:[%s1106_s16 + $0x1c0] sm:$0xff] %v400_v49  ;;  %v406_v61 = vcvt.s32.f32 %v217_v58  ;;  %v219_v63 = vld [vmem:[%s1091_s3 + $0x200] sm:$0xff]  ;;  %v220_v0 = vld [vmem:[%s1091_s3 + $0x208] sm:$0xff]  ;;  %590 = vst [vmem:[%s1106_s16 + $0x1c8] sm:$0xff] %v401_v53  ;;  %v407_v1 = vcvt.s32.f32 %v218_v62 }
  0x61   : > { %591 = vst [vmem:[%s1106_s16 + $0x1d0] sm:$0xff] %v402_v54  ;;  %592 = vst [vmem:[%s1106_s16 + $0x1d8] sm:$0xff] %v403_v55  ;;  %v408_v2 = vcvt.s32.f32 %v219_v63  ;;  %v409_v3 = vcvt.s32.f32 %v220_v0  ;;  %v221_v4 = vld [vmem:[%s1091_s3 + $0x210] sm:$0xff]  ;;  %v222_v5 = vld [vmem:[%s1091_s3 + $0x218] sm:$0xff] }
  0x62   : > { %v223_v6 = vld [vmem:[%s1091_s3 + $0x220] sm:$0xff]  ;;  %593 = vst [vmem:[%s1106_s16 + $0x1e0] sm:$0xff] %v404_v59  ;;  %594 = vst [vmem:[%s1106_s16 + $0x1e8] sm:$0xff] %v405_v60  ;;  %v410_v7 = vcvt.s32.f32 %v221_v4  ;;  %v411_v8 = vcvt.s32.f32 %v222_v5  ;;  %v224_v10 = vld [vmem:[%s1091_s3 + $0x228] sm:$0xff] }
  0x63   : > { %595 = vst [vmem:[%s1106_s16 + $0x1f0] sm:$0xff] %v406_v61  ;;  %v412_v9 = vcvt.s32.f32 %v223_v6  ;;  %v225_v11 = vld [vmem:[%s1091_s3 + $0x230] sm:$0xff]  ;;  %v226_v12 = vld [vmem:[%s1091_s3 + $0x238] sm:$0xff]  ;;  %596 = vst [vmem:[%s1106_s16 + $0x1f8] sm:$0xff] %v407_v1  ;;  %v413_v13 = vcvt.s32.f32 %v224_v10 }
  0x64   : > { %597 = vst [vmem:[%s1106_s16 + $0x200] sm:$0xff] %v408_v2  ;;  %598 = vst [vmem:[%s1106_s16 + $0x208] sm:$0xff] %v409_v3  ;;  %v414_v14 = vcvt.s32.f32 %v225_v11  ;;  %v415_v15 = vcvt.s32.f32 %v226_v12  ;;  %v227_v16 = vld [vmem:[%s1091_s3 + $0x240] sm:$0xff]  ;;  %v228_v17 = vld [vmem:[%s1091_s3 + $0x248] sm:$0xff] }
  0x65   : > { %v229_v18 = vld [vmem:[%s1091_s3 + $0x250] sm:$0xff]  ;;  %599 = vst [vmem:[%s1106_s16 + $0x210] sm:$0xff] %v410_v7  ;;  %600 = vst [vmem:[%s1106_s16 + $0x218] sm:$0xff] %v411_v8  ;;  %v416_v19 = vcvt.s32.f32 %v227_v16  ;;  %v417_v20 = vcvt.s32.f32 %v228_v17  ;;  %v230_v22 = vld [vmem:[%s1091_s3 + $0x258] sm:$0xff] }
  0x66   : > { %601 = vst [vmem:[%s1106_s16 + $0x220] sm:$0xff] %v412_v9  ;;  %v418_v21 = vcvt.s32.f32 %v229_v18  ;;  %v231_v23 = vld [vmem:[%s1091_s3 + $0x260] sm:$0xff]  ;;  %v232_v24 = vld [vmem:[%s1091_s3 + $0x268] sm:$0xff]  ;;  %602 = vst [vmem:[%s1106_s16 + $0x228] sm:$0xff] %v413_v13  ;;  %v419_v25 = vcvt.s32.f32 %v230_v22 }
  0x67   : > { %603 = vst [vmem:[%s1106_s16 + $0x230] sm:$0xff] %v414_v14  ;;  %604 = vst [vmem:[%s1106_s16 + $0x238] sm:$0xff] %v415_v15  ;;  %v420_v26 = vcvt.s32.f32 %v231_v23  ;;  %v421_v27 = vcvt.s32.f32 %v232_v24  ;;  %v233_v28 = vld [vmem:[%s1091_s3 + $0x270] sm:$0xff]  ;;  %v234_v29 = vld [vmem:[%s1091_s3 + $0x278] sm:$0xff] }
  0x68   : > { %v235_v30 = vld [vmem:[%s1091_s3 + $0x280] sm:$0xff]  ;;  %605 = vst [vmem:[%s1106_s16 + $0x240] sm:$0xff] %v416_v19  ;;  %606 = vst [vmem:[%s1106_s16 + $0x248] sm:$0xff] %v417_v20  ;;  %v422_v31 = vcvt.s32.f32 %v233_v28  ;;  %v423_v32 = vcvt.s32.f32 %v234_v29  ;;  %v236_v34 = vld [vmem:[%s1091_s3 + $0x288] sm:$0xff] }
  0x69   : > { %607 = vst [vmem:[%s1106_s16 + $0x250] sm:$0xff] %v418_v21  ;;  %v424_v33 = vcvt.s32.f32 %v235_v30  ;;  %v237_v35 = vld [vmem:[%s1091_s3 + $0x290] sm:$0xff]  ;;  %v238_v36 = vld [vmem:[%s1091_s3 + $0x298] sm:$0xff]  ;;  %608 = vst [vmem:[%s1106_s16 + $0x258] sm:$0xff] %v419_v25  ;;  %v425_v37 = vcvt.s32.f32 %v236_v34 }
  0x6a   : > { %609 = vst [vmem:[%s1106_s16 + $0x260] sm:$0xff] %v420_v26  ;;  %610 = vst [vmem:[%s1106_s16 + $0x268] sm:$0xff] %v421_v27  ;;  %v426_v38 = vcvt.s32.f32 %v237_v35  ;;  %v427_v39 = vcvt.s32.f32 %v238_v36  ;;  %v239_v40 = vld [vmem:[%s1091_s3 + $0x2a0] sm:$0xff]  ;;  %v240_v41 = vld [vmem:[%s1091_s3 + $0x2a8] sm:$0xff] }
  0x6b   : > { %v241_v42 = vld [vmem:[%s1091_s3 + $0x2b0] sm:$0xff]  ;;  %611 = vst [vmem:[%s1106_s16 + $0x270] sm:$0xff] %v422_v31  ;;  %612 = vst [vmem:[%s1106_s16 + $0x278] sm:$0xff] %v423_v32  ;;  %v428_v43 = vcvt.s32.f32 %v239_v40  ;;  %v429_v44 = vcvt.s32.f32 %v240_v41  ;;  %v242_v46 = vld [vmem:[%s1091_s3 + $0x2b8] sm:$0xff] }
  0x6c   : > { %613 = vst [vmem:[%s1106_s16 + $0x280] sm:$0xff] %v424_v33  ;;  %v430_v45 = vcvt.s32.f32 %v241_v42  ;;  %v243_v47 = vld [vmem:[%s1091_s3 + $0x2c0] sm:$0xff]  ;;  %v244_v48 = vld [vmem:[%s1091_s3 + $0x2c8] sm:$0xff]  ;;  %614 = vst [vmem:[%s1106_s16 + $0x288] sm:$0xff] %v425_v37  ;;  %v431_v49 = vcvt.s32.f32 %v242_v46 }
  0x6d   : > { %615 = vst [vmem:[%s1106_s16 + $0x290] sm:$0xff] %v426_v38  ;;  %616 = vst [vmem:[%s1106_s16 + $0x298] sm:$0xff] %v427_v39  ;;  %v432_v50 = vcvt.s32.f32 %v243_v47  ;;  %v433_v51 = vcvt.s32.f32 %v244_v48  ;;  %v245_v52 = vld [vmem:[%s1091_s3 + $0x2d0] sm:$0xff]  ;;  %v246_v53 = vld [vmem:[%s1091_s3 + $0x2d8] sm:$0xff] }
  0x6e   : > { %v247_v54 = vld [vmem:[%s1091_s3 + $0x2e0] sm:$0xff]  ;;  %617 = vst [vmem:[%s1106_s16 + $0x2a0] sm:$0xff] %v428_v43  ;;  %618 = vst [vmem:[%s1106_s16 + $0x2a8] sm:$0xff] %v429_v44  ;;  %v434_v55 = vcvt.s32.f32 %v245_v52  ;;  %v435_v56 = vcvt.s32.f32 %v246_v53  ;;  %v248_v58 = vld [vmem:[%s1091_s3 + $0x2e8] sm:$0xff] }
  0x6f   : > { %619 = vst [vmem:[%s1106_s16 + $0x2b0] sm:$0xff] %v430_v45  ;;  %v436_v57 = vcvt.s32.f32 %v247_v54  ;;  %v249_v59 = vld [vmem:[%s1091_s3 + $0x2f0] sm:$0xff]  ;;  %v250_v60 = vld [vmem:[%s1091_s3 + $0x2f8] sm:$0xff]  ;;  %620 = vst [vmem:[%s1106_s16 + $0x2b8] sm:$0xff] %v431_v49  ;;  %v437_v61 = vcvt.s32.f32 %v248_v58 }
  0x70   : > { %621 = vst [vmem:[%s1106_s16 + $0x2c0] sm:$0xff] %v432_v50  ;;  %622 = vst [vmem:[%s1106_s16 + $0x2c8] sm:$0xff] %v433_v51  ;;  %v438_v62 = vcvt.s32.f32 %v249_v59  ;;  %v439_v63 = vcvt.s32.f32 %v250_v60  ;;  %v251_v0 = vld [vmem:[%s1091_s3 + $0x300] sm:$0xff]  ;;  %v252_v1 = vld [vmem:[%s1091_s3 + $0x308] sm:$0xff] }
  0x71   : > { %v253_v2 = vld [vmem:[%s1091_s3 + $0x310] sm:$0xff]  ;;  %623 = vst [vmem:[%s1106_s16 + $0x2d0] sm:$0xff] %v434_v55  ;;  %624 = vst [vmem:[%s1106_s16 + $0x2d8] sm:$0xff] %v435_v56  ;;  %v440_v3 = vcvt.s32.f32 %v251_v0  ;;  %v441_v4 = vcvt.s32.f32 %v252_v1  ;;  %v254_v6 = vld [vmem:[%s1091_s3 + $0x318] sm:$0xff] }
  0x72   : > { %625 = vst [vmem:[%s1106_s16 + $0x2e0] sm:$0xff] %v436_v57  ;;  %v442_v5 = vcvt.s32.f32 %v253_v2  ;;  %v255_v7 = vld [vmem:[%s1091_s3 + $0x320] sm:$0xff]  ;;  %v256_v8 = vld [vmem:[%s1091_s3 + $0x328] sm:$0xff]  ;;  %626 = vst [vmem:[%s1106_s16 + $0x2e8] sm:$0xff] %v437_v61  ;;  %v443_v9 = vcvt.s32.f32 %v254_v6 }
  0x73   : > { %627 = vst [vmem:[%s1106_s16 + $0x2f0] sm:$0xff] %v438_v62  ;;  %628 = vst [vmem:[%s1106_s16 + $0x2f8] sm:$0xff] %v439_v63  ;;  %v444_v10 = vcvt.s32.f32 %v255_v7  ;;  %v445_v11 = vcvt.s32.f32 %v256_v8  ;;  %v257_v12 = vld [vmem:[%s1091_s3 + $0x330] sm:$0xff]  ;;  %v258_v13 = vld [vmem:[%s1091_s3 + $0x338] sm:$0xff] }
  0x74   : > { %v259_v14 = vld [vmem:[%s1091_s3 + $0x340] sm:$0xff]  ;;  %629 = vst [vmem:[%s1106_s16 + $0x300] sm:$0xff] %v440_v3  ;;  %630 = vst [vmem:[%s1106_s16 + $0x308] sm:$0xff] %v441_v4  ;;  %v446_v15 = vcvt.s32.f32 %v257_v12  ;;  %v447_v16 = vcvt.s32.f32 %v258_v13  ;;  %v260_v18 = vld [vmem:[%s1091_s3 + $0x348] sm:$0xff] }
  0x75   : > { %631 = vst [vmem:[%s1106_s16 + $0x310] sm:$0xff] %v442_v5  ;;  %v448_v17 = vcvt.s32.f32 %v259_v14  ;;  %v261_v19 = vld [vmem:[%s1091_s3 + $0x350] sm:$0xff]  ;;  %v262_v20 = vld [vmem:[%s1091_s3 + $0x358] sm:$0xff]  ;;  %632 = vst [vmem:[%s1106_s16 + $0x318] sm:$0xff] %v443_v9  ;;  %v449_v21 = vcvt.s32.f32 %v260_v18 }
  0x76   : > { %633 = vst [vmem:[%s1106_s16 + $0x320] sm:$0xff] %v444_v10  ;;  %634 = vst [vmem:[%s1106_s16 + $0x328] sm:$0xff] %v445_v11  ;;  %v450_v22 = vcvt.s32.f32 %v261_v19  ;;  %v451_v23 = vcvt.s32.f32 %v262_v20  ;;  %v263_v24 = vld [vmem:[%s1091_s3 + $0x360] sm:$0xff]  ;;  %v264_v25 = vld [vmem:[%s1091_s3 + $0x368] sm:$0xff] }
  0x77   : > { %v265_v26 = vld [vmem:[%s1091_s3 + $0x370] sm:$0xff]  ;;  %635 = vst [vmem:[%s1106_s16 + $0x330] sm:$0xff] %v446_v15  ;;  %636 = vst [vmem:[%s1106_s16 + $0x338] sm:$0xff] %v447_v16  ;;  %v452_v27 = vcvt.s32.f32 %v263_v24  ;;  %v453_v28 = vcvt.s32.f32 %v264_v25  ;;  %v266_v30 = vld [vmem:[%s1091_s3 + $0x378] sm:$0xff] }
  0x78   : > { %637 = vst [vmem:[%s1106_s16 + $0x340] sm:$0xff] %v448_v17  ;;  %v454_v29 = vcvt.s32.f32 %v265_v26  ;;  %v267_v31 = vld [vmem:[%s1091_s3 + $0x380] sm:$0xff]  ;;  %v268_v32 = vld [vmem:[%s1091_s3 + $0x388] sm:$0xff]  ;;  %638 = vst [vmem:[%s1106_s16 + $0x348] sm:$0xff] %v449_v21  ;;  %v455_v33 = vcvt.s32.f32 %v266_v30 }
  0x79   : > { %639 = vst [vmem:[%s1106_s16 + $0x350] sm:$0xff] %v450_v22  ;;  %640 = vst [vmem:[%s1106_s16 + $0x358] sm:$0xff] %v451_v23  ;;  %v456_v34 = vcvt.s32.f32 %v267_v31  ;;  %v457_v35 = vcvt.s32.f32 %v268_v32  ;;  %v269_v36 = vld [vmem:[%s1091_s3 + $0x390] sm:$0xff]  ;;  %v270_v37 = vld [vmem:[%s1091_s3 + $0x398] sm:$0xff] }
  0x7a   : > { %v271_v38 = vld [vmem:[%s1091_s3 + $0x3a0] sm:$0xff]  ;;  %641 = vst [vmem:[%s1106_s16 + $0x360] sm:$0xff] %v452_v27  ;;  %642 = vst [vmem:[%s1106_s16 + $0x368] sm:$0xff] %v453_v28  ;;  %v458_v39 = vcvt.s32.f32 %v269_v36  ;;  %v459_v40 = vcvt.s32.f32 %v270_v37  ;;  %v272_v42 = vld [vmem:[%s1091_s3 + $0x3a8] sm:$0xff] }
  0x7b   : > { %643 = vst [vmem:[%s1106_s16 + $0x370] sm:$0xff] %v454_v29  ;;  %v460_v41 = vcvt.s32.f32 %v271_v38  ;;  %v273_v43 = vld [vmem:[%s1091_s3 + $0x3b0] sm:$0xff]  ;;  %v274_v44 = vld [vmem:[%s1091_s3 + $0x3b8] sm:$0xff]  ;;  %644 = vst [vmem:[%s1106_s16 + $0x378] sm:$0xff] %v455_v33  ;;  %v461_v45 = vcvt.s32.f32 %v272_v42 }
  0x7c   : > { %645 = vst [vmem:[%s1106_s16 + $0x380] sm:$0xff] %v456_v34  ;;  %646 = vst [vmem:[%s1106_s16 + $0x388] sm:$0xff] %v457_v35  ;;  %v462_v46 = vcvt.s32.f32 %v273_v43  ;;  %v463_v47 = vcvt.s32.f32 %v274_v44  ;;  %v275_v48 = vld [vmem:[%s1091_s3 + $0x3c0] sm:$0xff]  ;;  %v276_v49 = vld [vmem:[%s1091_s3 + $0x3c8] sm:$0xff] }
  0x7d   : > { %v277_v50 = vld [vmem:[%s1091_s3 + $0x3d0] sm:$0xff]  ;;  %647 = vst [vmem:[%s1106_s16 + $0x390] sm:$0xff] %v458_v39  ;;  %648 = vst [vmem:[%s1106_s16 + $0x398] sm:$0xff] %v459_v40  ;;  %v464_v51 = vcvt.s32.f32 %v275_v48  ;;  %v465_v52 = vcvt.s32.f32 %v276_v49  ;;  %v278_v54 = vld [vmem:[%s1091_s3 + $0x3d8] sm:$0xff] }
  0x7e   : > { %649 = vst [vmem:[%s1106_s16 + $0x3a0] sm:$0xff] %v460_v41  ;;  %v466_v53 = vcvt.s32.f32 %v277_v50  ;;  %v279_v55 = vld [vmem:[%s1091_s3 + $0x3e0] sm:$0xff]  ;;  %v280_v56 = vld [vmem:[%s1091_s3 + $0x3e8] sm:$0xff]  ;;  %650 = vst [vmem:[%s1106_s16 + $0x3a8] sm:$0xff] %v461_v45  ;;  %v467_v57 = vcvt.s32.f32 %v278_v54 }
  0x7f   : > { %651 = vst [vmem:[%s1106_s16 + $0x3b0] sm:$0xff] %v462_v46  ;;  %652 = vst [vmem:[%s1106_s16 + $0x3b8] sm:$0xff] %v463_v47  ;;  %v468_v58 = vcvt.s32.f32 %v279_v55  ;;  %v469_v59 = vcvt.s32.f32 %v280_v56  ;;  %v281_v60 = vld [vmem:[%s1091_s3 + $0x3f0] sm:$0xff]  ;;  %v282_v61 = vld [vmem:[%s1091_s3 + $0x3f8] sm:$0xff] }
  0x80   : > { %v283_v62 = vld [vmem:[%s1091_s3 + $0x400] sm:$0xff]  ;;  %653 = vst [vmem:[%s1106_s16 + $0x3c0] sm:$0xff] %v464_v51  ;;  %654 = vst [vmem:[%s1106_s16 + $0x3c8] sm:$0xff] %v465_v52  ;;  %v470_v63 = vcvt.s32.f32 %v281_v60  ;;  %v471_v0 = vcvt.s32.f32 %v282_v61  ;;  %v284_v2 = vld [vmem:[%s1091_s3 + $0x408] sm:$0xff] }
  0x81   : > { %655 = vst [vmem:[%s1106_s16 + $0x3d0] sm:$0xff] %v466_v53  ;;  %v472_v1 = vcvt.s32.f32 %v283_v62  ;;  %v285_v3 = vld [vmem:[%s1091_s3 + $0x410] sm:$0xff]  ;;  %v286_v4 = vld [vmem:[%s1091_s3 + $0x418] sm:$0xff]  ;;  %656 = vst [vmem:[%s1106_s16 + $0x3d8] sm:$0xff] %v467_v57  ;;  %v473_v5 = vcvt.s32.f32 %v284_v2 }
  0x82   : > { %657 = vst [vmem:[%s1106_s16 + $0x3e0] sm:$0xff] %v468_v58  ;;  %658 = vst [vmem:[%s1106_s16 + $0x3e8] sm:$0xff] %v469_v59  ;;  %v474_v6 = vcvt.s32.f32 %v285_v3  ;;  %v475_v7 = vcvt.s32.f32 %v286_v4  ;;  %v287_v8 = vld [vmem:[%s1091_s3 + $0x420] sm:$0xff]  ;;  %v288_v9 = vld [vmem:[%s1091_s3 + $0x428] sm:$0xff] }
  0x83   : > { %v289_v10 = vld [vmem:[%s1091_s3 + $0x430] sm:$0xff]  ;;  %659 = vst [vmem:[%s1106_s16 + $0x3f0] sm:$0xff] %v470_v63  ;;  %660 = vst [vmem:[%s1106_s16 + $0x3f8] sm:$0xff] %v471_v0  ;;  %v476_v11 = vcvt.s32.f32 %v287_v8  ;;  %v477_v12 = vcvt.s32.f32 %v288_v9  ;;  %v290_v14 = vld [vmem:[%s1091_s3 + $0x438] sm:$0xff] }
  0x84   : > { %661 = vst [vmem:[%s1106_s16 + $0x400] sm:$0xff] %v472_v1  ;;  %v478_v13 = vcvt.s32.f32 %v289_v10  ;;  %v291_v15 = vld [vmem:[%s1091_s3 + $0x440] sm:$0xff]  ;;  %v292_v16 = vld [vmem:[%s1091_s3 + $0x448] sm:$0xff]  ;;  %662 = vst [vmem:[%s1106_s16 + $0x408] sm:$0xff] %v473_v5  ;;  %v479_v17 = vcvt.s32.f32 %v290_v14 }
  0x85   : > { %663 = vst [vmem:[%s1106_s16 + $0x410] sm:$0xff] %v474_v6  ;;  %664 = vst [vmem:[%s1106_s16 + $0x418] sm:$0xff] %v475_v7  ;;  %v480_v18 = vcvt.s32.f32 %v291_v15  ;;  %v481_v19 = vcvt.s32.f32 %v292_v16  ;;  %v293_v20 = vld [vmem:[%s1091_s3 + $0x450] sm:$0xff]  ;;  %v294_v21 = vld [vmem:[%s1091_s3 + $0x458] sm:$0xff] }
  0x86   : > { %v295_v22 = vld [vmem:[%s1091_s3 + $0x460] sm:$0xff]  ;;  %665 = vst [vmem:[%s1106_s16 + $0x420] sm:$0xff] %v476_v11  ;;  %666 = vst [vmem:[%s1106_s16 + $0x428] sm:$0xff] %v477_v12  ;;  %v482_v23 = vcvt.s32.f32 %v293_v20  ;;  %v483_v24 = vcvt.s32.f32 %v294_v21  ;;  %v296_v26 = vld [vmem:[%s1091_s3 + $0x468] sm:$0xff] }
  0x87   : > { %667 = vst [vmem:[%s1106_s16 + $0x430] sm:$0xff] %v478_v13  ;;  %v484_v25 = vcvt.s32.f32 %v295_v22  ;;  %v297_v27 = vld [vmem:[%s1091_s3 + $0x470] sm:$0xff]  ;;  %v298_v28 = vld [vmem:[%s1091_s3 + $0x478] sm:$0xff]  ;;  %668 = vst [vmem:[%s1106_s16 + $0x438] sm:$0xff] %v479_v17  ;;  %v485_v29 = vcvt.s32.f32 %v296_v26 }
  0x88   : > { %669 = vst [vmem:[%s1106_s16 + $0x440] sm:$0xff] %v480_v18  ;;  %670 = vst [vmem:[%s1106_s16 + $0x448] sm:$0xff] %v481_v19  ;;  %v486_v30 = vcvt.s32.f32 %v297_v27  ;;  %v487_v31 = vcvt.s32.f32 %v298_v28  ;;  %v299_v32 = vld [vmem:[%s1091_s3 + $0x480] sm:$0xff]  ;;  %v300_v33 = vld [vmem:[%s1091_s3 + $0x488] sm:$0xff] }
  0x89   : > { %v301_v34 = vld [vmem:[%s1091_s3 + $0x490] sm:$0xff]  ;;  %671 = vst [vmem:[%s1106_s16 + $0x450] sm:$0xff] %v482_v23  ;;  %672 = vst [vmem:[%s1106_s16 + $0x458] sm:$0xff] %v483_v24  ;;  %v488_v35 = vcvt.s32.f32 %v299_v32  ;;  %v489_v36 = vcvt.s32.f32 %v300_v33  ;;  %v302_v38 = vld [vmem:[%s1091_s3 + $0x498] sm:$0xff] }
  0x8a   : > { %673 = vst [vmem:[%s1106_s16 + $0x460] sm:$0xff] %v484_v25  ;;  %v490_v37 = vcvt.s32.f32 %v301_v34  ;;  %v303_v39 = vld [vmem:[%s1091_s3 + $0x4a0] sm:$0xff]  ;;  %v304_v40 = vld [vmem:[%s1091_s3 + $0x4a8] sm:$0xff]  ;;  %674 = vst [vmem:[%s1106_s16 + $0x468] sm:$0xff] %v485_v29  ;;  %v491_v41 = vcvt.s32.f32 %v302_v38 }
  0x8b   : > { %675 = vst [vmem:[%s1106_s16 + $0x470] sm:$0xff] %v486_v30  ;;  %676 = vst [vmem:[%s1106_s16 + $0x478] sm:$0xff] %v487_v31  ;;  %v492_v42 = vcvt.s32.f32 %v303_v39  ;;  %v493_v43 = vcvt.s32.f32 %v304_v40  ;;  %v305_v44 = vld [vmem:[%s1091_s3 + $0x4b0] sm:$0xff]  ;;  %v306_v45 = vld [vmem:[%s1091_s3 + $0x4b8] sm:$0xff] }
  0x8c   : > { %v307_v46 = vld [vmem:[%s1091_s3 + $0x4c0] sm:$0xff]  ;;  %677 = vst [vmem:[%s1106_s16 + $0x480] sm:$0xff] %v488_v35  ;;  %678 = vst [vmem:[%s1106_s16 + $0x488] sm:$0xff] %v489_v36  ;;  %v494_v47 = vcvt.s32.f32 %v305_v44  ;;  %v495_v48 = vcvt.s32.f32 %v306_v45  ;;  %v308_v50 = vld [vmem:[%s1091_s3 + $0x4c8] sm:$0xff] }
  0x8d   : > { %679 = vst [vmem:[%s1106_s16 + $0x490] sm:$0xff] %v490_v37  ;;  %v496_v49 = vcvt.s32.f32 %v307_v46  ;;  %v309_v51 = vld [vmem:[%s1091_s3 + $0x4d0] sm:$0xff]  ;;  %v310_v52 = vld [vmem:[%s1091_s3 + $0x4d8] sm:$0xff]  ;;  %680 = vst [vmem:[%s1106_s16 + $0x498] sm:$0xff] %v491_v41  ;;  %v497_v53 = vcvt.s32.f32 %v308_v50 }
  0x8e   : > { %681 = vst [vmem:[%s1106_s16 + $0x4a0] sm:$0xff] %v492_v42  ;;  %682 = vst [vmem:[%s1106_s16 + $0x4a8] sm:$0xff] %v493_v43  ;;  %v498_v54 = vcvt.s32.f32 %v309_v51  ;;  %v499_v55 = vcvt.s32.f32 %v310_v52  ;;  %v311_v56 = vld [vmem:[%s1091_s3 + $0x4e0] sm:$0xff]  ;;  %v312_v57 = vld [vmem:[%s1091_s3 + $0x4e8] sm:$0xff] }
  0x8f   : > { %v313_v58 = vld [vmem:[%s1091_s3 + $0x4f0] sm:$0xff]  ;;  %683 = vst [vmem:[%s1106_s16 + $0x4b0] sm:$0xff] %v494_v47  ;;  %684 = vst [vmem:[%s1106_s16 + $0x4b8] sm:$0xff] %v495_v48  ;;  %v500_v59 = vcvt.s32.f32 %v311_v56  ;;  %v501_v60 = vcvt.s32.f32 %v312_v57  ;;  %v314_v62 = vld [vmem:[%s1091_s3 + $0x4f8] sm:$0xff] }
  0x90   : > { %685 = vst [vmem:[%s1106_s16 + $0x4c0] sm:$0xff] %v496_v49  ;;  %v502_v61 = vcvt.s32.f32 %v313_v58  ;;  %v315_v63 = vld [vmem:[%s1091_s3 + $0x500] sm:$0xff]  ;;  %v316_v0 = vld [vmem:[%s1091_s3 + $0x508] sm:$0xff]  ;;  %686 = vst [vmem:[%s1106_s16 + $0x4c8] sm:$0xff] %v497_v53  ;;  %v503_v1 = vcvt.s32.f32 %v314_v62 }
  0x91   : > { %687 = vst [vmem:[%s1106_s16 + $0x4d0] sm:$0xff] %v498_v54  ;;  %688 = vst [vmem:[%s1106_s16 + $0x4d8] sm:$0xff] %v499_v55  ;;  %v504_v2 = vcvt.s32.f32 %v315_v63  ;;  %v505_v3 = vcvt.s32.f32 %v316_v0  ;;  %v317_v4 = vld [vmem:[%s1091_s3 + $0x510] sm:$0xff]  ;;  %v318_v5 = vld [vmem:[%s1091_s3 + $0x518] sm:$0xff] }
  0x92   : > { %v319_v6 = vld [vmem:[%s1091_s3 + $0x520] sm:$0xff]  ;;  %689 = vst [vmem:[%s1106_s16 + $0x4e0] sm:$0xff] %v500_v59  ;;  %690 = vst [vmem:[%s1106_s16 + $0x4e8] sm:$0xff] %v501_v60  ;;  %v506_v7 = vcvt.s32.f32 %v317_v4  ;;  %v507_v8 = vcvt.s32.f32 %v318_v5  ;;  %v320_v10 = vld [vmem:[%s1091_s3 + $0x528] sm:$0xff] }
  0x93   : > { %691 = vst [vmem:[%s1106_s16 + $0x4f0] sm:$0xff] %v502_v61  ;;  %v508_v9 = vcvt.s32.f32 %v319_v6  ;;  %v321_v11 = vld [vmem:[%s1091_s3 + $0x530] sm:$0xff]  ;;  %v322_v12 = vld [vmem:[%s1091_s3 + $0x538] sm:$0xff]  ;;  %692 = vst [vmem:[%s1106_s16 + $0x4f8] sm:$0xff] %v503_v1  ;;  %v509_v13 = vcvt.s32.f32 %v320_v10 }
  0x94   : > { %693 = vst [vmem:[%s1106_s16 + $0x500] sm:$0xff] %v504_v2  ;;  %694 = vst [vmem:[%s1106_s16 + $0x508] sm:$0xff] %v505_v3  ;;  %v510_v14 = vcvt.s32.f32 %v321_v11  ;;  %v511_v15 = vcvt.s32.f32 %v322_v12  ;;  %v323_v16 = vld [vmem:[%s1091_s3 + $0x540] sm:$0xff]  ;;  %v324_v17 = vld [vmem:[%s1091_s3 + $0x548] sm:$0xff] }
  0x95   : > { %v325_v18 = vld [vmem:[%s1091_s3 + $0x550] sm:$0xff]  ;;  %695 = vst [vmem:[%s1106_s16 + $0x510] sm:$0xff] %v506_v7  ;;  %696 = vst [vmem:[%s1106_s16 + $0x518] sm:$0xff] %v507_v8  ;;  %v512_v19 = vcvt.s32.f32 %v323_v16  ;;  %v513_v20 = vcvt.s32.f32 %v324_v17  ;;  %v326_v22 = vld [vmem:[%s1091_s3 + $0x558] sm:$0xff] }
  0x96   : > { %697 = vst [vmem:[%s1106_s16 + $0x520] sm:$0xff] %v508_v9  ;;  %v514_v21 = vcvt.s32.f32 %v325_v18  ;;  %v327_v23 = vld [vmem:[%s1091_s3 + $0x560] sm:$0xff]  ;;  %v328_v24 = vld [vmem:[%s1091_s3 + $0x568] sm:$0xff]  ;;  %698 = vst [vmem:[%s1106_s16 + $0x528] sm:$0xff] %v509_v13  ;;  %v515_v25 = vcvt.s32.f32 %v326_v22 }
  0x97   : > { %699 = vst [vmem:[%s1106_s16 + $0x530] sm:$0xff] %v510_v14  ;;  %700 = vst [vmem:[%s1106_s16 + $0x538] sm:$0xff] %v511_v15  ;;  %v516_v26 = vcvt.s32.f32 %v327_v23  ;;  %v517_v27 = vcvt.s32.f32 %v328_v24  ;;  %v329_v28 = vld [vmem:[%s1091_s3 + $0x570] sm:$0xff]  ;;  %v330_v29 = vld [vmem:[%s1091_s3 + $0x578] sm:$0xff] }
  0x98   : > { %v331_v30 = vld [vmem:[%s1091_s3 + $0x580] sm:$0xff]  ;;  %701 = vst [vmem:[%s1106_s16 + $0x540] sm:$0xff] %v512_v19  ;;  %702 = vst [vmem:[%s1106_s16 + $0x548] sm:$0xff] %v513_v20  ;;  %v518_v31 = vcvt.s32.f32 %v329_v28  ;;  %v519_v32 = vcvt.s32.f32 %v330_v29  ;;  %v332_v34 = vld [vmem:[%s1091_s3 + $0x588] sm:$0xff] }
  0x99   : > { %703 = vst [vmem:[%s1106_s16 + $0x550] sm:$0xff] %v514_v21  ;;  %v520_v33 = vcvt.s32.f32 %v331_v30  ;;  %v333_v35 = vld [vmem:[%s1091_s3 + $0x590] sm:$0xff]  ;;  %v334_v36 = vld [vmem:[%s1091_s3 + $0x598] sm:$0xff]  ;;  %704 = vst [vmem:[%s1106_s16 + $0x558] sm:$0xff] %v515_v25  ;;  %v521_v37 = vcvt.s32.f32 %v332_v34 }
  0x9a   : > { %705 = vst [vmem:[%s1106_s16 + $0x560] sm:$0xff] %v516_v26  ;;  %706 = vst [vmem:[%s1106_s16 + $0x568] sm:$0xff] %v517_v27  ;;  %v522_v38 = vcvt.s32.f32 %v333_v35  ;;  %v523_v39 = vcvt.s32.f32 %v334_v36  ;;  %v335_v40 = vld [vmem:[%s1091_s3 + $0x5a0] sm:$0xff]  ;;  %v336_v41 = vld [vmem:[%s1091_s3 + $0x5a8] sm:$0xff] }
  0x9b   : > { %v337_v42 = vld [vmem:[%s1091_s3 + $0x5b0] sm:$0xff]  ;;  %707 = vst [vmem:[%s1106_s16 + $0x570] sm:$0xff] %v518_v31  ;;  %708 = vst [vmem:[%s1106_s16 + $0x578] sm:$0xff] %v519_v32  ;;  %v524_v43 = vcvt.s32.f32 %v335_v40  ;;  %v525_v44 = vcvt.s32.f32 %v336_v41  ;;  %v338_v46 = vld [vmem:[%s1091_s3 + $0x5b8] sm:$0xff] }
  0x9c   : > { %709 = vst [vmem:[%s1106_s16 + $0x580] sm:$0xff] %v520_v33  ;;  %v526_v45 = vcvt.s32.f32 %v337_v42  ;;  %v339_v47 = vld [vmem:[%s1091_s3 + $0x5c0] sm:$0xff]  ;;  %v340_v48 = vld [vmem:[%s1091_s3 + $0x5c8] sm:$0xff]  ;;  %710 = vst [vmem:[%s1106_s16 + $0x588] sm:$0xff] %v521_v37  ;;  %v527_v49 = vcvt.s32.f32 %v338_v46 }
  0x9d   : > { %711 = vst [vmem:[%s1106_s16 + $0x590] sm:$0xff] %v522_v38  ;;  %712 = vst [vmem:[%s1106_s16 + $0x598] sm:$0xff] %v523_v39  ;;  %v528_v50 = vcvt.s32.f32 %v339_v47  ;;  %v529_v51 = vcvt.s32.f32 %v340_v48  ;;  %v341_v52 = vld [vmem:[%s1091_s3 + $0x5d0] sm:$0xff]  ;;  %v342_v53 = vld [vmem:[%s1091_s3 + $0x5d8] sm:$0xff] }
  0x9e   : > { %v343_v54 = vld [vmem:[%s1091_s3 + $0x5e0] sm:$0xff]  ;;  %713 = vst [vmem:[%s1106_s16 + $0x5a0] sm:$0xff] %v524_v43  ;;  %714 = vst [vmem:[%s1106_s16 + $0x5a8] sm:$0xff] %v525_v44  ;;  %v530_v55 = vcvt.s32.f32 %v341_v52  ;;  %v531_v56 = vcvt.s32.f32 %v342_v53  ;;  %729 = sbr.rel (!%p1034_p9) target bundleno = 191 (0xbf), region = 32 }
  0x9f   : > { %715 = vst [vmem:[%s1106_s16 + $0x5b0] sm:$0xff] %v526_v45  ;;  %v532_v57 = vcvt.s32.f32 %v343_v54  ;;  %716 = vst [vmem:[%s1106_s16 + $0x5b8] sm:$0xff] %v527_v49 }
  0xa0   : > { %717 = vst [vmem:[%s1106_s16 + $0x5c0] sm:$0xff] %v528_v50  ;;  %718 = vst [vmem:[%s1106_s16 + $0x5c8] sm:$0xff] %v529_v51 }
  0xa1   : > { %719 = vst [vmem:[%s1106_s16 + $0x5d0] sm:$0xff] %v530_v55  ;;  %720 = vst [vmem:[%s1106_s16 + $0x5d8] sm:$0xff] %v531_v56 }
  0xa2   : > { %721 = vst [vmem:[%s1106_s16 + $0x5e0] sm:$0xff] %v532_v57 }
  0xa3   : > { %s1551_s28 = smov (!%p732_p6, %s731_s28), 63 }
  0xa4   : > { %s1481_s2 = smul.u32 384, %s1551_s28 }
  0xa6   : > { %s737_s4 = ssub.s32 24192, %s1481_s2 }
  0xa7   : > { %738 = vsyncadd %s723_s23, %s737_s4  ;;  %p828_p10 = scmp.ne.s32.totalorder %s1481_s2, 0  ;;  %s844_s17 = smul.u32 24192, %s1011_s10 }
  0xa8   : > { %s744_s5 = sshll.u32 %s1106_s16, 4  ;;  %s977_s20 = smov [#allocation5]   ;;  %s1494_s5 = int_to_ptr.vmem [resolvable:$true] %s744_s5 }
  0xa9   : > { %s1492_s14 = scalar_lea.hbm %s1539_s1, %s844_s17  ;;  %s908_s19 = scalar_lea.vmem %s1494_s5, %s1481_s2 }
  0xaa   : > { %p909_p9 = scmp.ne.s32.totalorder %s1494_s5, %s908_s19  ;;  %s912_s21 = sshll.u32 %s977_s20, 4  ;;  %s913_s21 = int_to_ptr.vmem [resolvable:$false] %s912_s21 }
  0xab   : > { %s914_s10 = scalar_lea.vmem %s913_s21, 48384  ;;  %p915_p8 = scmp.lt.s32.totalorder %s1494_s5, %s913_s21 }
  0xac   : > { %p910_p13 = pnand %p909_p9, %p828_p10  ;;  %p916_p11 = scmp.lt.s32.totalorder %s914_s10, %s908_s19 }
  0xae   : > { %p911_p7 = pneg %p910_p13  ;;  %p917_p12 = por %p916_p11, %p915_p8 }
  0xb0   : > { %p918_p0 = pnand %p917_p12, %p911_p7 }
  0xb2   : > { %921 = shalt.err (!%p918_p0)
}
  0xb3   : > { %s922_s22 = scalar_lea.hbm %s1492_s14, %s1481_s2  ;;  %s926_s29 = scalar_lea.hbm %s1539_s1, 48768 }
  0xb4   : > { %p923_p1 = scmp.ne.s32.totalorder %s1492_s14, %s922_s22  ;;  %p927_p4 = scmp.lt.s32.totalorder %s1492_s14, %s1539_s1 }
  0xb5   : > { %p928_p5 = scmp.lt.s32.totalorder %s926_s29, %s922_s22 }
  0xb6   : > { %p924_p3 = pnand %p923_p1, %p828_p10 }
  0xb7   : > { %p929_p6 = por %p928_p5, %p927_p4 }
  0xb8   : > { %p925_p2 = pneg %p924_p3 }
  0xba   : > { %p930_p9 = pnand %p929_p6, %p925_p2 }
  0xbc   : > { %933 = shalt.err (!%p930_p9)
}
  0xbd   : > { %s978_s16 = smov 384   ;;  %s979_s25 = smov 24  }
  0xbe   : > { %750 = dma.vmem_to_hbm [thread:$0]  (%p828_p10), %s1494_s5, %s1481_s2, %s1492_s14, %s723_s23, %s978_s16, %s978_s16, %s979_s25  }
  0xbf PF: > { %p845_p13 = scmp.ge.s32.totalorder %s972_s9, 2  ;;  %s759_s28 = sand.u32 1, %s960_s6  }
  0xc0   : > { %p1543_p7 = scmp.ne.s32.totalorder %s1542_s18, 0  ;;  %s760_s4 = scalar_lea.sflag [#allocation4], %s759_s28 }
  0xc2   : > { %p840_p8 = pnand %p845_p13, %p1543_p7 }
  0xc4   : > { %p841_p11 = pneg %p840_p8 }
  0xc6   : > { %955 = dma.done.wait (%p841_p11), %s760_s4, 24192  }
  0xc7   : > { %957 = vsyncadd (%p841_p11), %s760_s4, 4294943104  ;;  %p14_p12 = scmp.ge.s32.totalorder %s1015_s12, 5   ;;  %s1544_s6 = smov %s964_s7 }
  0xc8   : > { %s1545_s7 = smov %s968_s8  ;;  %s1546_s8 = smov %s1027_s15 }
  0xc9   : > { %s1547_s9 = smov %s1015_s12  ;;  %16 = sbr.rel (!%p14_p12) target bundleno = 5 (0x5), region = 69 }
  0xce   :  { %765 = vsyncpa [#allocation3], 1 }
  0xcf   :  { %767 = vsyncpa [#allocation3 + $0x1], 1 }
  0xd0   :  { %768 = vsyncpa [#allocation4], 1 }
  0xd1   :  { %770 = vsyncpa [#allocation4 + $0x1], 1 }

</bundles_post_ra>
